<compile_context>
chip_gen: v7x
topology: tpu7x:2x2x1
jax: 0.10.0
libtpu: 0.0.40
codegen_flags: <defaults>
</compile_context>

<pallas_src>
import functools

import numpy as np
import jax
import jax.numpy as jnp
from jax.experimental import pallas as pl
from jax.experimental.pallas import tpu as pltpu


def _round_up(x, m):
    return ((x + m - 1) // m) * m


# -----------------------------------------------------------------------------
# Weight normalization (parameter glue, tiny, stays in f32)
# -----------------------------------------------------------------------------
def normalize_weight(w, eps=1e-4):
    """normalize() from the reference, applied to the (C_out, C_in, K) weight."""
    w = w.astype(jnp.float32)
    n = jnp.sqrt(jnp.sum(jnp.square(w), axis=(1, 2), keepdims=True))
    # NOTE: PyTorch source writes np.sqrt(a, b); intended EDM2 formula is
    # sqrt(a / b) = 1/sqrt(fan_in), which we use (deliberate deviation).
    alpha = np.sqrt(n.size / w.size)
    return w / (eps + alpha * n)


# -----------------------------------------------------------------------------
# Pallas kernels
# -----------------------------------------------------------------------------
def _conv_kernel_k1(xm_ref, b_ref, o_ref):
    """Single-tap case (K <= stride): plain tile matmul, f32 accumulate."""
    o_ref[...] = jnp.dot(xm_ref[...], b_ref[0],
                         preferred_element_type=jnp.float32).astype(o_ref.dtype)


def _conv_kernel(xm_ref, xh_ref, b_ref, o_ref, win_ref, *, n_shift, tl, halo_blk):
    """Shifted-tap conv matmul.

    xm_ref : (tl, C_fold)               main activation rows of this tile
    xh_ref : (halo_blk, C_fold)         halo rows (first rows of the next tile)
    b_ref  : (S, C_fold, C_out_pad)     weights grouped by row-shift s
    o_ref  : (tl, C_out_pad)            output tile (lane-dense)
    win_ref: (tl + halo_blk, C_fold)    VMEM scratch: contiguous haloed window
    """
    # Assemble the haloed window with a cheap VMEM-local copy (no HBM-side
    # duplication of overlapping tiles).
    win_ref[pl.ds(0, tl), :] = xm_ref[...]
    win_ref[pl.ds(tl, halo_blk), :] = xh_ref[...]

    # shift 0 reads the (aligned) main block directly
    acc = jnp.dot(xm_ref[...], b_ref[0], preferred_element_type=jnp.float32)
    # TODO(synk): fuse these shifts into one matmul over a (tl, S*C_fold) LHS
    # when C_fold < MXU depth (saves S-1 full-tile f32 VPU adds).
    for s in range(1, n_shift):            # static, short loop: ceil(K/stride)-1
        acc = acc + jnp.dot(win_ref[pl.ds(s, tl), :], b_ref[s],
                            preferred_element_type=jnp.float32)
    o_ref[...] = acc.astype(o_ref.dtype)   # store in compute/out dtype


# -----------------------------------------------------------------------------
# MP_Conv1d forward
# -----------------------------------------------------------------------------
def mp_conv1d(x, weight, stride=1, padding=0, *,
              compute_dtype=jnp.bfloat16, out_dtype=None, tile_l=512):
    """x: (N, C_in, L), weight: (C_out, C_in, K) -> (N, C_out, L_out).

    compute_dtype=bf16 is the fast path (f32 operands run the MXU in multi-pass
    mode, ~3x+ slower); accumulation is always f32.  Kernel output is stored in
    out_dtype (default: compute_dtype) so post-kernel passes move 2-byte data.
    """
    N, C_in, L = x.shape
    C_out, C_in_w, K = weight.shape
    assert C_in_w == C_in
    if out_dtype is None:
        out_dtype = compute_dtype

    # --- weight normalization (f32) ---
    fan_in = C_in * K
    w = normalize_weight(weight) / np.sqrt(fan_in)           # (C_out, C_in, K)

    # --- geometry: fold the conv stride into the lane (channel) dim ---
    L_out = (L + 2 * padding - K) // stride + 1
    assert L_out > 0
    S = -(-K // stride)                   # number of row shifts after folding
    halo = S - 1                          # extra rows a tile needs
    C_fold = stride * C_in                # stride phases folded onto lanes
    C_out_pad = _round_up(C_out, 128)     # lane-dense output stores
    halo_blk = _round_up(max(halo, 1), 8)
    item_c = jnp.dtype(compute_dtype).itemsize
    item_o = jnp.dtype(out_dtype).itemsize

    # --- L tile: as large as the VMEM budget allows ---
    tl = min(_round_up(L_out, halo_blk), _round_up(max(tile_l, halo_blk), halo_blk))

    def vmem_need(t):
        xin = 2 * (t + (halo_blk if S > 1 else 0)) * C_fold * item_c   # dbl-buffered x
        bw = 2 * S * _round_up(C_fold, 8) * C_out_pad * item_c         # weight slab (2 bufs)
        outb = 2 * t * C_out_pad * item_o                              # dbl-buffered out
        win = ((t + halo_blk) * C_fold * item_c) if S > 1 else 0       # scratch window
        return xin + bw + outb + win

    budget = 40 << 20                     # leaves slack inside v7x's 64 MiB VMEM
    while tl > halo_blk and vmem_need(tl) > budget:
        tl = max(halo_blk, _round_up(tl // 2, halo_blk))
    num_tiles = -(-L_out // tl)

    # --- activations: cast to bf16 FIRST, then NCL->NLC, pad, fold stride ---
    rows_blocks = num_tiles * tl + (halo_blk if S > 1 else 0)
    L_rows = max(rows_blocks, -(-(L + padding) // stride))
    L_ext = L_rows * stride
    xt = jnp.transpose(x.astype(compute_dtype), (0, 2, 1))             # (N, L, C_in)
    xt = jnp.pad(xt, ((0, 0), (padding, L_ext - L - padding), (0, 0)))
    xf = xt.reshape(N, L_rows, C_fold)                                 # stride folded into lanes
    # TODO(synk): accept/return channels-last to drop the two transpose passes
    # when the surrounding network keeps activations in NLC.

    # --- weights grouped by (shift s = k // stride, phase p = k % stride) ---
    w_pad = jnp.pad(w, ((0, 0), (0, 0), (0, S * stride - K)))          # (C_out, C_in, S*stride)
    b = jnp.transpose(w_pad, (2, 1, 0)).reshape(S, C_fold, C_out)      # b[s, p*C_in + c, co]
    b = jnp.pad(b, ((0, 0), (0, 0), (0, C_out_pad - C_out))).astype(compute_dtype)

    # --- Pallas call: grid (batch, L tiles), both axes parallel (megacore) ---
    tl_over_hb = tl // halo_blk
    x_main_spec = pl.BlockSpec((None, tl, C_fold), lambda n, i: (n, i, 0))
    b_spec = pl.BlockSpec((S, C_fold, C_out_pad), lambda n, i: (0, 0, 0))
    out_spec = pl.BlockSpec((None, tl, C_out_pad), lambda n, i: (n, i, 0))

    if S > 1:
        x_halo_spec = pl.BlockSpec((None, halo_blk, C_fold),
                                   lambda n, i: (n, (i + 1) * tl_over_hb, 0))
        in_specs = [x_main_spec, x_halo_spec, b_spec]
        operands = (xf, xf, b)
        scratch = [pltpu.VMEM((tl + halo_blk, C_fold), compute_dtype)]
        kernel = functools.partial(_conv_kernel, n_shift=S, tl=tl, halo_blk=halo_blk)
    else:
        in_specs = [x_main_spec, b_spec]
        operands = (xf, b)
        scratch = []
        kernel = _conv_kernel_k1

    flops = 2 * N * num_tiles * tl * (S * C_fold) * C_out_pad
    bytes_accessed = (xf.size * xf.dtype.itemsize + b.size * b.dtype.itemsize
                      + N * num_tiles * tl * C_out_pad * item_o)
    need = vmem_need(tl)

    out = pl.pallas_call(
        kernel,
        out_shape=jax.ShapeDtypeStruct((N, num_tiles * tl, C_out_pad), out_dtype),
        grid_spec=pltpu.PrefetchScalarGridSpec(
            num_scalar_prefetch=0,
            grid=(N, num_tiles),
            in_specs=in_specs,
            out_specs=out_spec,
            scratch_shapes=scratch,
        ),
        compiler_params=pltpu.CompilerParams(
            dimension_semantics=("parallel", "parallel"),
            vmem_limit_bytes=int(min(max(need + (8 << 20), 24 << 20), 56 << 20)),
        ),
        cost_estimate=pl.CostEstimate(flops=int(flops), transcendentals=0,
                                      bytes_accessed=int(bytes_accessed)),
    )(*operands)

    out = out[:, :L_out, :C_out]                      # drop tile / lane padding
    return jnp.transpose(out, (0, 2, 1))              # back to NCL


# -----------------------------------------------------------------------------
# Reference (pure JAX) for verification
# -----------------------------------------------------------------------------
def mp_conv1d_ref(x, weight, stride=1, padding=0):
    C_out, C_in, K = weight.shape
    w = normalize_weight(weight) / np.sqrt(C_in * K)
    return jax.lax.conv_general_dilated(
        x.astype(jnp.float32), w,
        window_strides=(stride,), padding=[(padding, padding)],
        dimension_numbers=("NCH", "OIH", "NCH"),
        precision=jax.lax.Precision.HIGHEST,
    )


if __name__ == "__main__":
    key = jax.random.PRNGKey(0)
    k1, k2, k3, k4 = jax.random.split(key, 4)

    conv = jax.jit(mp_conv1d, static_argnames=("stride", "padding", "compute_dtype",
                                               "out_dtype", "tile_l"))

    # SMALL deterministic inputs (torch.randn-style init for the weight).
    x_small = jax.random.normal(k1, (2, 4, 16), dtype=jnp.float32)
    w_small = jax.random.normal(k2, (8, 4, 3), dtype=jnp.float32)
    w_k1 = jax.random.normal(k2, (8, 4, 1), dtype=jnp.float32)
    x_med = jax.random.normal(k3, (2, 8, 64), dtype=jnp.float32)
    w_med = jax.random.normal(k4, (16, 8, 3), dtype=jnp.float32)

    # (x, weight, kwargs, tolerance)
    cases = [
        (x_small, w_small, dict(stride=1, padding=1), 3e-2),                       # bf16 fast path
        (x_small, w_small, dict(stride=2, padding=0), 3e-2),                       # strided, folded lanes
        (x_small, w_small, dict(stride=1, padding=1,
                                compute_dtype=jnp.float32), 1e-4),                 # f32 slow path
        (x_small, w_k1, dict(stride=1, padding=0), 3e-2),                          # K=1 (no halo) path
        (x_med, w_med, dict(stride=1, padding=1, tile_l=16), 3e-2),                # multi-tile halo crossing
        (x_med, w_med, dict(stride=2, padding=1, tile_l=16), 3e-2),                # multi-tile + stride
    ]

    ok = True
    worst = 0.0
    for xi, wi, kw, tol in cases:
        y = jax.block_until_ready(conv(xi, wi, **kw))
        y_ref = jax.block_until_ready(
            mp_conv1d_ref(xi, wi, stride=kw.get("stride", 1),
                          padding=kw.get("padding", 0)))
        y32 = np.asarray(y).astype(np.float32)
        r32 = np.asarray(y_ref).astype(np.float32)
        if y32.shape != r32.shape:
            ok = False
            continue
        diff = float(np.max(np.abs(y32 - r32)))
        worst = max(worst, diff)
        if not np.allclose(y32, r32, atol=tol, rtol=tol):
            ok = False

    if ok:
        print("KERNEL_OK")
    else:
        print(f"KERNEL_FAILED max_abs_diff={worst}")
</pallas_src>

<mosaic_0001>
module attributes {stable_mosaic.version = 11 : i64} {
  func.func @_conv_kernel(%arg0: i32, %arg1: i32, %arg2: memref<1x16x4xbf16, #tpu.memory_space<vmem>>, %arg3: memref<1x8x4xbf16, #tpu.memory_space<vmem>>, %arg4: memref<3x4x128xbf16, #tpu.memory_space<vmem>>, %arg5: memref<1x16x128xbf16, #tpu.memory_space<vmem>>, %arg6: memref<24x4xbf16, #tpu.memory_space<vmem>>) attributes {dimension_semantics = [#tpu.dimension_semantics<parallel>, #tpu.dimension_semantics<parallel>], iteration_bounds = array<i64: 2, 1>, scalar_prefetch = 0 : i64, scratch_operands = 1 : i64, tpu.core_type = #tpu.core_type<tc>, window_params = [{transform_indices = @transform_0, window_bounds = array<i64: 1, 16, 4>}, {transform_indices = @transform_1, window_bounds = array<i64: 1, 8, 4>}, {pipeline_mode = #tpu.pipeline_mode<synchronous>, transform_indices = @transform_2, window_bounds = array<i64: 3, 4, 128>}, {transform_indices = @transform_3, window_bounds = array<i64: 1, 16, 128>}]} {
    %c0 = arith.constant 0 : index
    %c0_0 = arith.constant 0 : index
    %c0_1 = arith.constant 0 : index
    %0 = vector.load %arg2[%c0, %c0_0, %c0_1] : memref<1x16x4xbf16, #tpu.memory_space<vmem>>, vector<1x16x4xbf16>
    %1 = vector.shape_cast %0 : vector<1x16x4xbf16> to vector<16x4xbf16>
    %c0_2 = arith.constant 0 : index
    %c0_3 = arith.constant 0 : index
    %2 = vector.load %arg6[%c0_2, %c0_3] : memref<24x4xbf16, #tpu.memory_space<vmem>>, vector<16x4xbf16>
    tpu.vector_store %arg6[%c0_2, %c0_3], %1 {strides = array<i32>} : memref<24x4xbf16, #tpu.memory_space<vmem>>, vector<16x4xbf16>,
    %c0_4 = arith.constant 0 : index
    %c0_5 = arith.constant 0 : index
    %c0_6 = arith.constant 0 : index
    %3 = vector.load %arg3[%c0_4, %c0_5, %c0_6] : memref<1x8x4xbf16, #tpu.memory_space<vmem>>, vector<1x8x4xbf16>
    %4 = vector.shape_cast %3 : vector<1x8x4xbf16> to vector<8x4xbf16>
    %c16 = arith.constant 16 : index
    %c0_7 = arith.constant 0 : index
    %5 = vector.load %arg6[%c16, %c0_7] : memref<24x4xbf16, #tpu.memory_space<vmem>>, vector<8x4xbf16>
    tpu.vector_store %arg6[%c16, %c0_7], %4 {strides = array<i32>} : memref<24x4xbf16, #tpu.memory_space<vmem>>, vector<8x4xbf16>,
    %c0_8 = arith.constant 0 : index
    %c0_9 = arith.constant 0 : index
    %c0_10 = arith.constant 0 : index
    %6 = vector.load %arg2[%c0_8, %c0_9, %c0_10] : memref<1x16x4xbf16, #tpu.memory_space<vmem>>, vector<1x16x4xbf16>
    %7 = vector.shape_cast %6 : vector<1x16x4xbf16> to vector<16x4xbf16>
    %c0_11 = arith.constant 0 : index
    %c0_12 = arith.constant 0 : index
    %c0_13 = arith.constant 0 : index
    %8 = vector.load %arg4[%c0_11, %c0_12, %c0_13] : memref<3x4x128xbf16, #tpu.memory_space<vmem>>, vector<1x4x128xbf16>
    %9 = vector.shape_cast %8 : vector<1x4x128xbf16> to vector<4x128xbf16>
    %cst = arith.constant dense<0.000000e+00> : vector<16x128xf32>
    %10 = tpu.matmul %7, %9, %cst {dimension_numbers = #tpu.dot_dimension_numbers<[1], [0], [0], [1], [0, 0, 1, 1], [], []>} : vector<16x4xbf16>, vector<4x128xbf16>, vector<16x128xf32> -> vector<16x128xf32>
    %c1 = arith.constant 1 : index
    %c0_14 = arith.constant 0 : index
    %11 = vector.load %arg6[%c1, %c0_14] : memref<24x4xbf16, #tpu.memory_space<vmem>>, vector<16x4xbf16>
    %c1_15 = arith.constant 1 : index
    %c0_16 = arith.constant 0 : index
    %c0_17 = arith.constant 0 : index
    %12 = vector.load %arg4[%c1_15, %c0_16, %c0_17] : memref<3x4x128xbf16, #tpu.memory_space<vmem>>, vector<1x4x128xbf16>
    %13 = vector.shape_cast %12 : vector<1x4x128xbf16> to vector<4x128xbf16>
    %cst_18 = arith.constant dense<0.000000e+00> : vector<16x128xf32>
    %14 = tpu.matmul %11, %13, %cst_18 {dimension_numbers = #tpu.dot_dimension_numbers<[1], [0], [0], [1], [0, 0, 1, 1], [], []>} : vector<16x4xbf16>, vector<4x128xbf16>, vector<16x128xf32> -> vector<16x128xf32>
    %15 = arith.addf %10, %14 : vector<16x128xf32>
    %c2 = arith.constant 2 : index
    %c0_19 = arith.constant 0 : index
    %16 = vector.load %arg6[%c2, %c0_19] : memref<24x4xbf16, #tpu.memory_space<vmem>>, vector<16x4xbf16>
    %c2_20 = arith.constant 2 : index
    %c0_21 = arith.constant 0 : index
    %c0_22 = arith.constant 0 : index
    %17 = vector.load %arg4[%c2_20, %c0_21, %c0_22] : memref<3x4x128xbf16, #tpu.memory_space<vmem>>, vector<1x4x128xbf16>
    %18 = vector.shape_cast %17 : vector<1x4x128xbf16> to vector<4x128xbf16>
    %cst_23 = arith.constant dense<0.000000e+00> : vector<16x128xf32>
    %19 = tpu.matmul %16, %18, %cst_23 {dimension_numbers = #tpu.dot_dimension_numbers<[1], [0], [0], [1], [0, 0, 1, 1], [], []>} : vector<16x4xbf16>, vector<4x128xbf16>, vector<16x128xf32> -> vector<16x128xf32>
    %20 = arith.addf %15, %19 : vector<16x128xf32>
    %21 = arith.truncf %20 : vector<16x128xf32> to vector<16x128xbf16>
    %c0_24 = arith.constant 0 : index
    %c0_25 = arith.constant 0 : index
    %c0_26 = arith.constant 0 : index
    %22 = vector.load %arg5[%c0_24, %c0_25, %c0_26] : memref<1x16x128xbf16, #tpu.memory_space<vmem>>, vector<1x16x128xbf16>
    %23 = vector.shape_cast %22 : vector<1x16x128xbf16> to vector<16x128xbf16>
    %24 = vector.shape_cast %21 : vector<16x128xbf16> to vector<1x16x128xbf16>
    tpu.vector_store %arg5[%c0_24, %c0_25, %c0_26], %24 {strides = array<i32>} : memref<1x16x128xbf16, #tpu.memory_space<vmem>>, vector<1x16x128xbf16>,
    return
  }
  func.func @transform_0(%arg0: i32, %arg1: i32) -> (i32, i32, i32) {
    %c0_i32 = arith.constant 0 : i32
    %c0_i32_0 = arith.constant 0 : i32
    return %arg0, %arg1, %c0_i32 : i32, i32, i32
  }
  func.func @transform_1(%arg0: i32, %arg1: i32) -> (i32, i32, i32) {
    %c1_i32 = arith.constant 1 : i32
    %0 = arith.addi %arg1, %c1_i32 : i32
    %c2_i32 = arith.constant 2 : i32
    %1 = arith.muli %0, %c2_i32 : i32
    %c0_i32 = arith.constant 0 : i32
    %c0_i32_0 = arith.constant 0 : i32
    return %arg0, %1, %c0_i32 : i32, i32, i32
  }
  func.func @transform_2(%arg0: i32, %arg1: i32) -> (i32, i32, i32) {
    %c0_i32 = arith.constant 0 : i32
    %c0_i32_0 = arith.constant 0 : i32
    %c0_i32_1 = arith.constant 0 : i32
    %c0_i32_2 = arith.constant 0 : i32
    return %c0_i32, %c0_i32_0, %c0_i32_1 : i32, i32, i32
  }
  func.func @transform_3(%arg0: i32, %arg1: i32) -> (i32, i32, i32) {
    %c0_i32 = arith.constant 0 : i32
    %c0_i32_0 = arith.constant 0 : i32
    return %arg0, %arg1, %c0_i32 : i32, i32, i32
  }
}

</mosaic_0001>

<bundles_post_ra>
// kernel: mp_conv1d.1
= control target key start
LH: loop header
LB: loop body
LE: loop exit
PB: predicated region body
PF: predicated region fallthrough
CT: control target
= control target key end

     0   :  { %s728_s12 = smov 0   ;;  %s730_s13 = smov 0   ;;  %s786_s0 = inlined_call_operand.vmem [shape: bf16[2,24,4], index: 0, kind: input, shape index: {}, may-alias: {0,1}]   ;;  %s787_s1 = inlined_call_operand.vmem [shape: bf16[2,24,4], index: 1, kind: input, shape index: {}, may-alias: {0,1}]   ;;  %s788_s2 = inlined_call_operand.vmem [shape: bf16[3,4,128], index: 2, kind: input, shape index: {}]   ;;  %s789_s3 = inlined_call_operand.vmem [shape: bf16[2,16,128], index: 3, kind: output, shape index: {}]  }
   0x1   :  { %s732_s14 = smov 0  }
   0x2 LB: > { %s25_s15 = sadd.s32 1, %s700_s13  ;;  %p591_p0 = scmp.ge.s32.totalorder %s704_s14, 1  ;;  %s704_s14 = sphi %s732_s14, %s13_s14   ;;  %s700_s13 = sphi %s730_s13, %s791_s13   ;;  %s696_s12 = sphi %s728_s12, %s790_s12  }
   0x3   : > { %p27_p1 = scmp.ge.s32.totalorder %s25_s15, 2  ;;  %p189_p2 = scmp.lt.s32.totalorder %s704_s14, 3 }
   0x5   : > { %s793_s15 = smov (%p27_p1, %s25_s15), 0  ;;  %p190_p3 = pnand %p591_p0, %p189_p2 }
   0x6   : > { %v285_v0 = vld [vmem:[%s788_s2] sm:$0x3] (!%p190_p3)  ;;  %vm316_vm0 = vcmask (!%p190_p3), 1041408   ;;  %p240_p4 = scmp.lt.s32.totalorder (!%p190_p3), %s696_s12, 1  ;;  %v706_v1 = vmov (!%p190_p3), 0.0   ;;  %vm707_vm1 = vmmov (!%p190_p3), 0  }
   0x7   : > { %193 = sbr.rel (%p190_p3) target bundleno = 256 (0x100), region = 32  ;;  %631 = vmatprep.subr.bf16.mxu0 (!%p190_p3), %v706_v1  ;;  %v370_v2 = vsel (!%p190_p3), %vm316_vm0, %v285_v0, 0  ;;  %633 = vmatprep.mubr.msk.bf16.mxu0 (!%p190_p3), %vm707_vm1, %v706_v1  ;;  %v596_v3 = vld [vmem:[%s788_s2 + $0x2] sm:$0x3] (!%p190_p3)  ;;  %vm278_vm2 = vcmask (!%p190_p3), 27648   ;;  %vm312_vm3 = vcmask (!%p190_p3), 31744  }
   0x8   : > { %632 = vmatpush3.bf16.msra.mxu0 (!%p190_p3), %v370_v2  ;;  %625 = vmatprep.subr.bf16.mxu1 (!%p190_p3), %v706_v1  ;;  %v318_v4 = vsel (!%p190_p3), %vm316_vm0, %v596_v3, 0  ;;  %v602_v5 = vld [vmem:[%s788_s2 + $0x4] sm:$0x3] (!%p190_p3)  ;;  %vm419_vm4 = vcmask (!%p190_p3), 1046528   ;;  %vm299_vm5 = vsmask.f32 (!%p190_p3), 7424 }
   0x9   : > { %637 = vmatprep.subr.bf16.mxu0 (!%p190_p3), %v706_v1  ;;  %627 = vmatprep.mubr.msk.bf16.mxu1 (!%p190_p3), %vm707_vm1, %v706_v1  ;;  %v427_v10 = vsel (!%p190_p3), %vm316_vm0, %v602_v5, 0 }
   0xa   : > { %626 = vmatpush3.bf16.msra.mxu1 (!%p190_p3), %v318_v4 }
   0xe   : > { %s795_s12 = smov (!%p240_p4, %s696_s12), 1 }
   0xf   : > { %s649_s20 = smul.u32 12, %s795_s12  ;;  %s611_s30 = sshll.u32 %s795_s12, 3 }
  0x10   : > { %s273_s6 = scalar_lea.vmem %s789_s3, %s611_s30 }
  0x11   : > { %s247_s25 = scalar_lea.vmem %s786_s0, %s649_s20  ;;  %s610_s26 = sadd.s32 8, %s649_s20 }
  0x12   : > { %s262_s29 = scalar_lea.vmem %s787_s1, %s610_s26  ;;  %v276_v6 = vld [vmem:[%s247_s25] sm:$0xf]  ;;  %v277_v7 = vld [vmem:[%s247_s25 + $0x4] sm:$0xf] }
  0x13   : > { %279 = vst.msk [vmem:[#allocation2] sm:$0xf] %vm278_vm2, %v276_v6  ;;  %280 = vst.msk [vmem:[#allocation2 + $0x4] sm:$0xf] %vm278_vm2, %v277_v7  ;;  %v281_v8 = vld [vmem:[%s262_s29] sm:$0xf] }
  0x14   : > { %v678_v9 = vld [vmem:[%s247_s25] sm:$0xff]   ;;  %282 = vst.msk [vmem:[#allocation2 + $0x8] sm:$0xf] %vm278_vm2, %v281_v8 }
  0x15   : > { %634 = vmatmul.mubr.msk.bf16.vlgmr.msra.gmra.mrb[0].mxu0 %vm312_vm3, %v678_v9 }
  0x16   : > { %638 = vmatpush3.bf16.msra.mxu0 %v427_v10  ;;  %639 = vmatprep.mubr.msk.bf16.mxu0 %vm707_vm1, %v706_v1 }
  0x1a   : > { %v287_v11 = vld [vmem:[#allocation2 + $0x4] sm:$0xf]  ;;  %v413_v12 = vld [vmem:[#allocation2] sm:$0xe] }
  0x1b   : > { %v286_v13 = vld [vmem:[#allocation2] sm:$0xf]  ;;  %v679_v14 = vld [vmem:[#allocation2 + $0x8] ss:$0 sps:$4 sm:$0x11]   ;;  %v603_v15 = vcombine.low %v413_v12, %v287_v11 }
  0x1c   : > { %v597_v16 = vcombine.low %v286_v13, %v287_v11  ;;  %v421_v18 = vrot.slane %v679_v14, 1  ;;  %v308_v21 = vshll.u32 %v679_v14, 16 }
  0x1d   : > { %v420_v17 = vrot.slane %v603_v15, 1 }
  0x1e   : > { %v301_v19 = vshrl.u32 %v597_v16, 16  ;;  %v303_v20 = vshll.u32 %v597_v16, 16  ;;  %v310_v24 = vrot.slane %v308_v21, 1 }
  0x1f   : > { %v422_v22 = vsel %vm419_vm4, %v420_v17, %v421_v18 }
  0x20   : > { %v305_v23 = vrot.slane %v303_v20, 1 }
  0x21   : > { %640 = vmatmul.mubr.msk.bf16.vlgmr.msra.gmra.mrb[0].mxu0 %vm312_vm3, %v422_v22 }
  0x22   : > { %v306_v25 = vor.u32 %v305_v23, %v301_v19 }
  0x24   : > { %v311_v26 = vsel %vm299_vm5, %v306_v25, %v310_v24 }
  0x25   : > { %628 = vmatmul.mubr.msk.bf16.vlgmr.msra.gmra.mrb[0].mxu1 %vm312_vm3, %v311_v26 }
  0xf4   : > { %v463_v27 = vpop.f32.mrb[0].mxu0 }
  0xf5   : > { %v641_v28 = vpop.f32.mrb[1].mxu0 }
  0xf6   : > { %v466_v29 = vpop.f32.mrb[2].mxu0 }
  0xf7   : > { %v642_v31 = vpop.f32.mrb[3].mxu0 }
  0xf8   : > { %v354_v30 = vpop.f32.mrb[0].mxu1 }
  0xf9   : > { %v643_v32 = vadd.f32 %v463_v27, %v354_v30  ;;  %v629_v33 = vpop.f32.mrb[1].mxu1 }
  0xfa   : > { %v357_v34 = vpop.f32.mrb[2].mxu1 }
  0xfb   : > { %v644_v35 = vadd.f32 %v466_v29, %v357_v34  ;;  %v630_v36 = vpop.f32.mrb[3].mxu1 }
  0xfd   : > { %v617_v37 = vpack.c.bf16 %v644_v35, %v643_v32 }
  0xff   : > { %618 = vst [vmem:[%s273_s6] sm:$0xff] %v617_v37  }
 0x100 PF: > { %s13_s14 = sadd.s32 1, %s704_s14   ;;  %s790_s12 = smov %s700_s13 }
 0x101   : > { %p10_p5 = scmp.ge.s32.totalorder %s13_s14, 4   ;;  %s791_s13 = smov %s793_s15 }
 0x103   :  { %12 = sbr.rel (!%p10_p5) target bundleno = 2 (0x2), region = 67 }

</bundles_post_ra>
